<compile_context>
chip_gen: v5e
topology: v5e:2x2
jax: 0.10.0
libtpu: 0.0.40
codegen_flags: <defaults>
</compile_context>

<pallas_src>
import functools

import jax
import jax.numpy as jnp
from jax.experimental import pallas as pl
from jax.experimental.pallas import tpu as pltpu


def _inverted_bottleneck_kernel(
    x_ref, w1_ref, b1_ref, wdw_ref, b2_ref, w3_ref, b3_ref, m_ref, o_ref,
    *, W, mxu_dtype):
  """One batch tile. x_ref: (C, N) with N = batch_tile * H * W on lanes."""
  N = x_ref.shape[1]

  # ---- conv1 (1x1, C -> 4C) + bn1 (scale pre-folded) + relu  [MXU] ----
  y = jnp.dot(w1_ref[...], x_ref[...].astype(mxu_dtype),
              preferred_element_type=jnp.float32)            # (C4, N) f32
  y = jnp.maximum(y + b1_ref[...], 0.0)

  # Precomputed 0/1 border masks (wrapper-side), rows:
  #   0: w_idx >= 1   1: w_idx <= W-2   2: h_idx >= 1   3: h_idx <= H-2
  col_l = m_ref[0:1, :]
  col_r = m_ref[1:2, :]
  row_t = m_ref[2:3, :]
  row_b = m_ref[3:4, :]

  # ---- depthwise conv2 (3x3, padding=1, groups=4C) + bn2 + relu ----
  # tap(dy,dx)[c, p] = y[c, p + dy*W + dx], zero outside the image.
  # Column taps (dx = -1/0/+1) are rolled and masked ONCE; row taps are +-W
  # rolls of the pre-masked column taps.  This is exact because N % W == 0,
  # so +-W rolls preserve the intra-row position (column masks commute with
  # row rolls) and wrap-around positions are zeroed by the row masks.
  col_taps = (
      pltpu.roll(y, 1, 1) * col_l,       # dx = -1
      y,                                 # dx =  0
      pltpu.roll(y, N - 1, 1) * col_r,   # dx = +1
  )
  row_masks = {-1: row_t, 1: row_b}

  parts = []
  for i_dy, dy in enumerate((-1, 0, 1)):
    part = None
    for i_dx in range(3):
      tap = col_taps[i_dx]
      if dy != 0:
        tap = pltpu.roll(tap, (-dy * W) % N, 1)
      contrib = tap * wdw_ref[:, i_dy * 3 + i_dx:i_dy * 3 + i_dx + 1]
      part = contrib if part is None else part + contrib
    if dy != 0:
      part = part * row_masks[dy]        # one row mask per ky
    parts.append(part)
  z = (parts[0] + parts[1]) + parts[2]
  z = jnp.maximum(z + b2_ref[...], 0.0)

  # ---- conv3 (1x1, 4C -> C) + bn3 + residual + relu  [MXU] ----
  o = jnp.dot(w3_ref[...], z.astype(mxu_dtype),
              preferred_element_type=jnp.float32)            # (C, N) f32
  # Re-read x_ref here (instead of holding it live across the whole body) so
  # regalloc does not have to keep the (C, nblk) slab in vregs across the
  # matmuls and the 8 rolled taps.
  o_ref[...] = jnp.maximum(o + b3_ref[...] + x_ref[...], 0.0)


def _fold_bn(params, mxu_dtype):
  """Fold eval-mode BN scales into conv weights (wrapper-side, once)."""
  w1, s1, b1, wdw, s2, b2, w3, s3, b3 = params
  C4 = w1.shape[0]
  w1f = (w1 * s1[:, None]).astype(mxu_dtype)                 # (C4, C)
  wdwf = (wdw.reshape(C4, 9) * s2[:, None]).astype(jnp.float32)  # (C4, 9)
  w3f = (w3 * s3[:, None]).astype(mxu_dtype)                 # (C, C4)
  return (w1f, b1[:, None].astype(jnp.float32),
          wdwf, b2[:, None].astype(jnp.float32),
          w3f, b3[:, None].astype(jnp.float32))


def _border_masks(H, W, nblk):
  """(4, nblk) f32 0/1 masks: [w>=1, w<=W-2, h>=1, h<=H-2] per lane."""
  pos = jnp.arange(nblk, dtype=jnp.int32)
  w_idx = pos % W
  h_idx = (pos // W) % H
  return jnp.stack([w_idx >= 1, w_idx <= W - 2,
                    h_idx >= 1, h_idx <= H - 2]).astype(jnp.float32)


def _pick_batch_tile(B, C, C4, H, W, vmem_budget_bytes):
  """Largest batch_tile whose footprint fits the budget while keeping >= 2
  grid steps (both v7x TensorCores busy + pipelined double-buffering)."""
  hw = H * W
  best = 1
  for d in range(1, B + 1):
    if B % d:
      continue
    nblk = d * hw
    if (nblk % 128 != 0) and (d != B):
      continue                                   # lane-dense block constraint
    # double-buffered f32 in/out blocks + ~3 live (C4, nblk) f32 intermediates
    # (y, z, rolled taps) + a bf16 copy of the x block for the MXU.
    est = 4 * nblk * (2 * 2 * C + 3 * C4) + 2 * nblk * C
    if est > vmem_budget_bytes:
      continue
    if B > 1 and (B // d) < 2:
      continue
    best = d
  if (best * hw) % 128 != 0 and best != B:
    best = B                                     # fall back to full-array block
  return best


def inverted_bottleneck_slab(x_cs, params, H, W, *, mxu_dtype=jnp.bfloat16,
                             batch_tile=None,
                             vmem_limit_bytes=32 * 1024 * 1024):
  """Operates on the resident channels-major slab (C, B*H*W); use this entry
  point to chain several Inverted_Bottleneck blocks without re-transposing."""
  C, N = x_cs.shape
  C4 = params[0].shape[0]
  HW = H * W
  assert N % HW == 0, "slab lanes must be whole images"
  B = N // HW

  if batch_tile is None:
    batch_tile = _pick_batch_tile(B, C, C4, H, W, vmem_limit_bytes // 2)
  assert B % batch_tile == 0
  n_tiles = B // batch_tile
  nblk = batch_tile * HW
  # Roll+mask depthwise requires whole images per tile; lane-dense stores
  # require nblk % 128 == 0 (or the full-array block).
  assert nblk % HW == 0
  assert nblk % 128 == 0 or nblk == N, (
      f"nblk={nblk} must be a multiple of 128 (or equal {N})")

  w1f, b1c, wdwf, b2c, w3f, b3c = _fold_bn(params, mxu_dtype)
  masks = _border_masks(H, W, nblk)

  kernel = functools.partial(_inverted_bottleneck_kernel, W=W,
                             mxu_dtype=mxu_dtype)
  const = lambda shape: pl.BlockSpec(shape, lambda i: (0,) * len(shape))

  return pl.pallas_call(
      kernel,
      out_shape=jax.ShapeDtypeStruct((C, N), jnp.float32),
      grid=(n_tiles,),
      in_specs=[
          pl.BlockSpec((C, nblk), lambda i: (0, i)),   # x tile (whole images)
          const((C4, C)), const((C4, 1)),              # conv1 weight / bn1 bias
          const((C4, 9)), const((C4, 1)),              # dw weights  / bn2 bias
          const((C, C4)), const((C, 1)),               # conv3 weight / bn3 bias
          const((4, nblk)),                            # precomputed border masks
      ],
      out_specs=pl.BlockSpec((C, nblk), lambda i: (0, i)),
      input_output_aliases={0: 0},                     # out aliases x slab in HBM
      compiler_params=pltpu.CompilerParams(
          dimension_semantics=("parallel",),
          vmem_limit_bytes=vmem_limit_bytes),
  )(x_cs, w1f, b1c, wdwf, b2c, w3f, b3c, masks)


def inverted_bottleneck(x_nchw, params, **kwargs):
  """PyTorch-convention NCHW wrapper around the slab kernel."""
  B, C, H, W = x_nchw.shape
  x_cs = jnp.transpose(x_nchw, (1, 0, 2, 3)).reshape(C, B * H * W)
  out_cs = inverted_bottleneck_slab(x_cs, params, H, W, **kwargs)
  return jnp.transpose(out_cs.reshape(C, B, H, W), (1, 0, 2, 3))


def init_params(key, dim):
  """Deterministic synthetic params in PyTorch weight layout (squeezed)."""
  C, C4 = dim, 4 * dim
  ks = jax.random.split(key, 15)
  w1 = jax.random.normal(ks[0], (C4, C), jnp.float32) * 0.1     # conv1 (4C,C,1,1)
  wdw = jax.random.normal(ks[1], (C4, 3, 3), jnp.float32) * 0.1  # conv2 (4C,1,3,3)
  w3 = jax.random.normal(ks[2], (C, C4), jnp.float32) * 0.1     # conv3 (C,4C,1,1)

  def bn_fold(kg, kb, km, kv, n):
    gamma = jax.random.uniform(kg, (n,), jnp.float32, 0.5, 1.5)
    beta = jax.random.normal(kb, (n,), jnp.float32) * 0.1
    mean = jax.random.normal(km, (n,), jnp.float32) * 0.1
    var = jax.random.uniform(kv, (n,), jnp.float32, 0.5, 1.5)
    scale = gamma / jnp.sqrt(var + 1e-5)
    bias = beta - mean * scale
    return scale, bias

  s1, b1 = bn_fold(ks[3], ks[4], ks[5], ks[6], C4)
  s2, b2 = bn_fold(ks[7], ks[8], ks[9], ks[10], C4)
  s3, b3 = bn_fold(ks[11], ks[12], ks[13], ks[14], C)
  return (w1, s1, b1, wdw, s2, b2, w3, s3, b3)


def reference(x_nchw, params, *, mxu_dtype=jnp.bfloat16):
  """Pure-JAX NCHW reference (eval-mode BN folded exactly like the kernel;
  the 1x1-conv operands use the same mxu_dtype so the comparison is
  apples-to-apples with the bf16 MXU path)."""
  w1, s1, b1, wdw, s2, b2, w3, s3, b3 = params
  B, C, H, W = x_nchw.shape
  C4 = w1.shape[0]
  w1f = (w1 * s1[:, None]).astype(mxu_dtype)
  wdwf = wdw.reshape(C4, 9) * s2[:, None]
  w3f = (w3 * s3[:, None]).astype(mxu_dtype)

  y = jnp.einsum('bchw,dc->bdhw', x_nchw.astype(mxu_dtype), w1f,
                 preferred_element_type=jnp.float32)
  y = jax.nn.relu(y + b1[None, :, None, None])
  yp = jnp.pad(y, ((0, 0), (0, 0), (1, 1), (1, 1)))
  z = jnp.zeros_like(y)
  for ky in range(3):
    for kx in range(3):
      z = z + yp[:, :, ky:ky + H, kx:kx + W] * wdwf[None, :, ky * 3 + kx, None, None]
  z = jax.nn.relu(z + b2[None, :, None, None])
  o = jnp.einsum('bdhw,cd->bchw', z.astype(mxu_dtype), w3f,
                 preferred_element_type=jnp.float32)
  o = o + b3[None, :, None, None] + x_nchw
  return jax.nn.relu(o)


if __name__ == "__main__":
  dim, B, H, W = 4, 2, 16, 16
  key = jax.random.PRNGKey(0)
  kx, kp = jax.random.split(key)

  # PyTorch-convention NCHW input.
  x_nchw = jax.random.normal(kx, (B, dim, H, W), jnp.float32)
  params = init_params(kp, dim)

  out = inverted_bottleneck(x_nchw, params)           # bf16 MXU operands
  out = jax.block_until_ready(out)
  assert out.shape == (B, dim, H, W)

  # Apples-to-apples check (same bf16 rounding of the 1x1-conv operands).
  ref = reference(x_nchw, params, mxu_dtype=jnp.bfloat16)
  err = jnp.max(jnp.abs(out - ref))
  assert jnp.allclose(out, ref, atol=1e-3, rtol=1e-3), f"max abs err {err}"

  # Semantic sanity vs. the pure-f32 module forward (bf16 MXU error only).
  ref_f32 = reference(x_nchw, params, mxu_dtype=jnp.float32)
  err_f32 = jnp.max(jnp.abs(out - ref_f32))
  assert jnp.allclose(out, ref_f32, atol=1e-1, rtol=1e-1), \
      f"max abs err vs f32 reference {err_f32}"

  print("KERNEL_OK")
</pallas_src>

<mosaic_0001>
module attributes {stable_mosaic.version = 11 : i64} {
  func.func @_inverted_bottleneck_kernel(%arg0: i32, %arg1: memref<4x256xf32, #tpu.memory_space<vmem>>, %arg2: memref<16x4xbf16, #tpu.memory_space<vmem>>, %arg3: memref<16x1xf32, #tpu.memory_space<vmem>>, %arg4: memref<16x9xf32, #tpu.memory_space<vmem>>, %arg5: memref<16x1xf32, #tpu.memory_space<vmem>>, %arg6: memref<4x16xbf16, #tpu.memory_space<vmem>>, %arg7: memref<4x1xf32, #tpu.memory_space<vmem>>, %arg8: memref<4x256xf32, #tpu.memory_space<vmem>>, %arg9: memref<4x256xf32, #tpu.memory_space<vmem>>) attributes {dimension_semantics = [#tpu.dimension_semantics<parallel>], iteration_bounds = array<i64: 2>, scalar_prefetch = 0 : i64, scratch_operands = 0 : i64, tpu.core_type = #tpu.core_type<tc>, window_params = [{transform_indices = @transform_0, window_bounds = array<i64: 4, 256>}, {pipeline_mode = #tpu.pipeline_mode<synchronous>, transform_indices = @transform_1, window_bounds = array<i64: 16, 4>}, {pipeline_mode = #tpu.pipeline_mode<synchronous>, transform_indices = @transform_2, window_bounds = array<i64: 16, 1>}, {pipeline_mode = #tpu.pipeline_mode<synchronous>, transform_indices = @transform_3, window_bounds = array<i64: 16, 9>}, {pipeline_mode = #tpu.pipeline_mode<synchronous>, transform_indices = @transform_4, window_bounds = array<i64: 16, 1>}, {pipeline_mode = #tpu.pipeline_mode<synchronous>, transform_indices = @transform_5, window_bounds = array<i64: 4, 16>}, {pipeline_mode = #tpu.pipeline_mode<synchronous>, transform_indices = @transform_6, window_bounds = array<i64: 4, 1>}, {pipeline_mode = #tpu.pipeline_mode<synchronous>, transform_indices = @transform_7, window_bounds = array<i64: 4, 256>}, {transform_indices = @transform_8, window_bounds = array<i64: 4, 256>}]} {
    %c0 = arith.constant 0 : index
    %c0_0 = arith.constant 0 : index
    %0 = vector.load %arg2[%c0, %c0_0] : memref<16x4xbf16, #tpu.memory_space<vmem>>, vector<16x4xbf16>
    %c0_1 = arith.constant 0 : index
    %c0_2 = arith.constant 0 : index
    %1 = vector.load %arg1[%c0_1, %c0_2] : memref<4x256xf32, #tpu.memory_space<vmem>>, vector<4x256xf32>
    %2 = arith.truncf %1 : vector<4x256xf32> to vector<4x256xbf16>
    %cst = arith.constant dense<0.000000e+00> : vector<16x256xf32>
    %3 = tpu.matmul %0, %2, %cst {dimension_numbers = #tpu.dot_dimension_numbers<[1], [0], [0], [1], [0, 0, 1, 1], [], []>} : vector<16x4xbf16>, vector<4x256xbf16>, vector<16x256xf32> -> vector<16x256xf32>
    %c0_3 = arith.constant 0 : index
    %c0_4 = arith.constant 0 : index
    %4 = vector.load %arg3[%c0_3, %c0_4] : memref<16x1xf32, #tpu.memory_space<vmem>>, vector<16x1xf32>
    %5 = vector.broadcast %4 : vector<16x1xf32> to vector<16x256xf32>
    %6 = arith.addf %3, %5 : vector<16x256xf32>
    %cst_5 = arith.constant 0.000000e+00 : f32
    %7 = vector.broadcast %cst_5 : f32 to vector<16x256xf32>
    %8 = arith.maximumf %6, %7 : vector<16x256xf32>
    %c0_6 = arith.constant 0 : index
    %c0_7 = arith.constant 0 : index
    %9 = vector.load %arg8[%c0_6, %c0_7] : memref<4x256xf32, #tpu.memory_space<vmem>>, vector<1x256xf32>
    %c1 = arith.constant 1 : index
    %c0_8 = arith.constant 0 : index
    %10 = vector.load %arg8[%c1, %c0_8] : memref<4x256xf32, #tpu.memory_space<vmem>>, vector<1x256xf32>
    %c2 = arith.constant 2 : index
    %c0_9 = arith.constant 0 : index
    %11 = vector.load %arg8[%c2, %c0_9] : memref<4x256xf32, #tpu.memory_space<vmem>>, vector<1x256xf32>
    %c3 = arith.constant 3 : index
    %c0_10 = arith.constant 0 : index
    %12 = vector.load %arg8[%c3, %c0_10] : memref<4x256xf32, #tpu.memory_space<vmem>>, vector<1x256xf32>
    %c1_i32 = arith.constant 1 : i32
    %13 = tpu.dynamic_rotate %8 by %c1_i32 dim 1 : vector<16x256xf32>, i32 -> vector<16x256xf32>
    %14 = vector.broadcast %9 : vector<1x256xf32> to vector<16x256xf32>
    %15 = arith.mulf %13, %14 : vector<16x256xf32>
    %c255_i32 = arith.constant 255 : i32
    %16 = tpu.dynamic_rotate %8 by %c255_i32 dim 1 : vector<16x256xf32>, i32 -> vector<16x256xf32>
    %17 = vector.broadcast %10 : vector<1x256xf32> to vector<16x256xf32>
    %18 = arith.mulf %16, %17 : vector<16x256xf32>
    %c16_i32 = arith.constant 16 : i32
    %19 = tpu.dynamic_rotate %15 by %c16_i32 dim 1 : vector<16x256xf32>, i32 -> vector<16x256xf32>
    %c0_11 = arith.constant 0 : index
    %c0_12 = arith.constant 0 : index
    %20 = vector.load %arg4[%c0_11, %c0_12] : memref<16x9xf32, #tpu.memory_space<vmem>>, vector<16x1xf32>
    %21 = vector.broadcast %20 : vector<16x1xf32> to vector<16x256xf32>
    %22 = arith.mulf %19, %21 : vector<16x256xf32>
    %c16_i32_13 = arith.constant 16 : i32
    %23 = tpu.dynamic_rotate %8 by %c16_i32_13 dim 1 : vector<16x256xf32>, i32 -> vector<16x256xf32>
    %c0_14 = arith.constant 0 : index
    %c1_15 = arith.constant 1 : index
    %24 = vector.load %arg4[%c0_14, %c1_15] : memref<16x9xf32, #tpu.memory_space<vmem>>, vector<16x1xf32>
    %25 = vector.broadcast %24 : vector<16x1xf32> to vector<16x256xf32>
    %26 = arith.mulf %23, %25 : vector<16x256xf32>
    %27 = arith.addf %22, %26 : vector<16x256xf32>
    %c16_i32_16 = arith.constant 16 : i32
    %28 = tpu.dynamic_rotate %18 by %c16_i32_16 dim 1 : vector<16x256xf32>, i32 -> vector<16x256xf32>
    %c0_17 = arith.constant 0 : index
    %c2_18 = arith.constant 2 : index
    %29 = vector.load %arg4[%c0_17, %c2_18] : memref<16x9xf32, #tpu.memory_space<vmem>>, vector<16x1xf32>
    %30 = vector.broadcast %29 : vector<16x1xf32> to vector<16x256xf32>
    %31 = arith.mulf %28, %30 : vector<16x256xf32>
    %32 = arith.addf %27, %31 : vector<16x256xf32>
    %33 = vector.broadcast %11 : vector<1x256xf32> to vector<16x256xf32>
    %34 = arith.mulf %32, %33 : vector<16x256xf32>
    %c0_19 = arith.constant 0 : index
    %c3_20 = arith.constant 3 : index
    %35 = vector.load %arg4[%c0_19, %c3_20] : memref<16x9xf32, #tpu.memory_space<vmem>>, vector<16x1xf32>
    %36 = vector.broadcast %35 : vector<16x1xf32> to vector<16x256xf32>
    %37 = arith.mulf %15, %36 : vector<16x256xf32>
    %c0_21 = arith.constant 0 : index
    %c4 = arith.constant 4 : index
    %38 = vector.load %arg4[%c0_21, %c4] : memref<16x9xf32, #tpu.memory_space<vmem>>, vector<16x1xf32>
    %39 = vector.broadcast %38 : vector<16x1xf32> to vector<16x256xf32>
    %40 = arith.mulf %8, %39 : vector<16x256xf32>
    %41 = arith.addf %37, %40 : vector<16x256xf32>
    %c0_22 = arith.constant 0 : index
    %c5 = arith.constant 5 : index
    %42 = vector.load %arg4[%c0_22, %c5] : memref<16x9xf32, #tpu.memory_space<vmem>>, vector<16x1xf32>
    %43 = vector.broadcast %42 : vector<16x1xf32> to vector<16x256xf32>
    %44 = arith.mulf %18, %43 : vector<16x256xf32>
    %45 = arith.addf %41, %44 : vector<16x256xf32>
    %c240_i32 = arith.constant 240 : i32
    %46 = tpu.dynamic_rotate %15 by %c240_i32 dim 1 : vector<16x256xf32>, i32 -> vector<16x256xf32>
    %c0_23 = arith.constant 0 : index
    %c6 = arith.constant 6 : index
    %47 = vector.load %arg4[%c0_23, %c6] : memref<16x9xf32, #tpu.memory_space<vmem>>, vector<16x1xf32>
    %48 = vector.broadcast %47 : vector<16x1xf32> to vector<16x256xf32>
    %49 = arith.mulf %46, %48 : vector<16x256xf32>
    %c240_i32_24 = arith.constant 240 : i32
    %50 = tpu.dynamic_rotate %8 by %c240_i32_24 dim 1 : vector<16x256xf32>, i32 -> vector<16x256xf32>
    %c0_25 = arith.constant 0 : index
    %c7 = arith.constant 7 : index
    %51 = vector.load %arg4[%c0_25, %c7] : memref<16x9xf32, #tpu.memory_space<vmem>>, vector<16x1xf32>
    %52 = vector.broadcast %51 : vector<16x1xf32> to vector<16x256xf32>
    %53 = arith.mulf %50, %52 : vector<16x256xf32>
    %54 = arith.addf %49, %53 : vector<16x256xf32>
    %c240_i32_26 = arith.constant 240 : i32
    %55 = tpu.dynamic_rotate %18 by %c240_i32_26 dim 1 : vector<16x256xf32>, i32 -> vector<16x256xf32>
    %c0_27 = arith.constant 0 : index
    %c8 = arith.constant 8 : index
    %56 = vector.load %arg4[%c0_27, %c8] : memref<16x9xf32, #tpu.memory_space<vmem>>, vector<16x1xf32>
    %57 = vector.broadcast %56 : vector<16x1xf32> to vector<16x256xf32>
    %58 = arith.mulf %55, %57 : vector<16x256xf32>
    %59 = arith.addf %54, %58 : vector<16x256xf32>
    %60 = vector.broadcast %12 : vector<1x256xf32> to vector<16x256xf32>
    %61 = arith.mulf %59, %60 : vector<16x256xf32>
    %62 = arith.addf %34, %45 : vector<16x256xf32>
    %63 = arith.addf %62, %61 : vector<16x256xf32>
    %c0_28 = arith.constant 0 : index
    %c0_29 = arith.constant 0 : index
    %64 = vector.load %arg5[%c0_28, %c0_29] : memref<16x1xf32, #tpu.memory_space<vmem>>, vector<16x1xf32>
    %65 = vector.broadcast %64 : vector<16x1xf32> to vector<16x256xf32>
    %66 = arith.addf %63, %65 : vector<16x256xf32>
    %cst_30 = arith.constant 0.000000e+00 : f32
    %67 = vector.broadcast %cst_30 : f32 to vector<16x256xf32>
    %68 = arith.maximumf %66, %67 : vector<16x256xf32>
    %c0_31 = arith.constant 0 : index
    %c0_32 = arith.constant 0 : index
    %69 = vector.load %arg6[%c0_31, %c0_32] : memref<4x16xbf16, #tpu.memory_space<vmem>>, vector<4x16xbf16>
    %70 = arith.truncf %68 : vector<16x256xf32> to vector<16x256xbf16>
    %cst_33 = arith.constant dense<0.000000e+00> : vector<4x256xf32>
    %71 = tpu.matmul %69, %70, %cst_33 {dimension_numbers = #tpu.dot_dimension_numbers<[1], [0], [0], [1], [0, 0, 1, 1], [], []>} : vector<4x16xbf16>, vector<16x256xbf16>, vector<4x256xf32> -> vector<4x256xf32>
    %c0_34 = arith.constant 0 : index
    %c0_35 = arith.constant 0 : index
    %72 = vector.load %arg7[%c0_34, %c0_35] : memref<4x1xf32, #tpu.memory_space<vmem>>, vector<4x1xf32>
    %73 = vector.broadcast %72 : vector<4x1xf32> to vector<4x256xf32>
    %74 = arith.addf %71, %73 : vector<4x256xf32>
    %c0_36 = arith.constant 0 : index
    %c0_37 = arith.constant 0 : index
    %75 = vector.load %arg1[%c0_36, %c0_37] : memref<4x256xf32, #tpu.memory_space<vmem>>, vector<4x256xf32>
    %76 = arith.addf %74, %75 : vector<4x256xf32>
    %cst_38 = arith.constant 0.000000e+00 : f32
    %77 = vector.broadcast %cst_38 : f32 to vector<4x256xf32>
    %78 = arith.maximumf %76, %77 : vector<4x256xf32>
    %c0_39 = arith.constant 0 : index
    %c0_40 = arith.constant 0 : index
    %79 = vector.load %arg9[%c0_39, %c0_40] : memref<4x256xf32, #tpu.memory_space<vmem>>, vector<4x256xf32>
    tpu.vector_store %arg9[%c0_39, %c0_40], %78 {strides = array<i32>} : memref<4x256xf32, #tpu.memory_space<vmem>>, vector<4x256xf32>,
    return
  }
  func.func @transform_0(%arg0: i32) -> (i32, i32) {
    %c0_i32 = arith.constant 0 : i32
    %c0_i32_0 = arith.constant 0 : i32
    return %c0_i32, %arg0 : i32, i32
  }
  func.func @transform_1(%arg0: i32) -> (i32, i32) {
    %c0_i32 = arith.constant 0 : i32
    %c0_i32_0 = arith.constant 0 : i32
    %c0_i32_1 = arith.constant 0 : i32
    return %c0_i32, %c0_i32_0 : i32, i32
  }
  func.func @transform_2(%arg0: i32) -> (i32, i32) {
    %c0_i32 = arith.constant 0 : i32
    %c0_i32_0 = arith.constant 0 : i32
    %c0_i32_1 = arith.constant 0 : i32
    return %c0_i32, %c0_i32_0 : i32, i32
  }
  func.func @transform_3(%arg0: i32) -> (i32, i32) {
    %c0_i32 = arith.constant 0 : i32
    %c0_i32_0 = arith.constant 0 : i32
    %c0_i32_1 = arith.constant 0 : i32
    return %c0_i32, %c0_i32_0 : i32, i32
  }
  func.func @transform_4(%arg0: i32) -> (i32, i32) {
    %c0_i32 = arith.constant 0 : i32
    %c0_i32_0 = arith.constant 0 : i32
    %c0_i32_1 = arith.constant 0 : i32
    return %c0_i32, %c0_i32_0 : i32, i32
  }
  func.func @transform_5(%arg0: i32) -> (i32, i32) {
    %c0_i32 = arith.constant 0 : i32
    %c0_i32_0 = arith.constant 0 : i32
    %c0_i32_1 = arith.constant 0 : i32
    return %c0_i32, %c0_i32_0 : i32, i32
  }
  func.func @transform_6(%arg0: i32) -> (i32, i32) {
    %c0_i32 = arith.constant 0 : i32
    %c0_i32_0 = arith.constant 0 : i32
    %c0_i32_1 = arith.constant 0 : i32
    return %c0_i32, %c0_i32_0 : i32, i32
  }
  func.func @transform_7(%arg0: i32) -> (i32, i32) {
    %c0_i32 = arith.constant 0 : i32
    %c0_i32_0 = arith.constant 0 : i32
    %c0_i32_1 = arith.constant 0 : i32
    return %c0_i32, %c0_i32_0 : i32, i32
  }
  func.func @transform_8(%arg0: i32) -> (i32, i32) {
    %c0_i32 = arith.constant 0 : i32
    %c0_i32_0 = arith.constant 0 : i32
    return %c0_i32, %arg0 : i32, i32
  }
}

</mosaic_0001>

<bundles_post_ra>
// kernel: tpu_custom_call.1
= control target key start
LH: loop header
LB: loop body
LE: loop exit
PB: predicated region body
PF: predicated region fallthrough
CT: control target
= control target key end

     0   :  { %13 = vsyncpa [#allocation3], 0  ;;  %s1519_s0 = inlined_call_operand.hbm [shape: f32[4,512], index: 0, kind: input, shape index: {}, may-alias: {0,8}]   ;;  %s1520_s1 = inlined_call_operand.vmem [shape: bf16[16,4], index: 1, kind: input, shape index: {}]   ;;  %s1521_s2 = inlined_call_operand.vmem [shape: f32[16,1], index: 2, kind: input, shape index: {}]   ;;  %s1522_s3 = inlined_call_operand.vmem [shape: f32[16,9], index: 3, kind: input, shape index: {}]   ;;  %s1523_s4 = inlined_call_operand.vmem [shape: f32[16,1], index: 4, kind: input, shape index: {}]   ;;  %s1524_s5 = inlined_call_operand.vmem [shape: bf16[4,16], index: 5, kind: input, shape index: {}]   ;;  %s1525_s6 = inlined_call_operand.vmem [shape: f32[4,1], index: 6, kind: input, shape index: {}]   ;;  %s1526_s7 = inlined_call_operand.vmem [shape: f32[4,256], index: 7, kind: input, shape index: {}]   ;;  %s1527_s8 = inlined_call_operand.hbm [shape: f32[4,512], index: 8, kind: output, shape index: {}, may-alias: {0,8}]  }
   0x1   :  { %15 = vsyncpa [#allocation3 + $0x1], 0 }
   0x2   :  { %16 = vsyncpa [#allocation4], 0 }
   0x3   :  { %18 = vsyncpa [#allocation4 + $0x1], 0  ;;  %s1113_s27 = smov 0   ;;  %s1115_s28 = smov 0  }
   0x4   :  { %s1117_s29 = smov 0   ;;  %s1119_s30 = smov 0  }
   0x5 LB: > { %1529 = sst [smem:[#allocation8_spill]] %s1049_s29  ;;  %s1134_s9 = sadd.s32 4294967295, %s1053_s30   ;;  %s1053_s30 = sphi %s1119_s30, %s1541_s30   ;;  %s1049_s29 = sphi %s1117_s29, %s1538_s29   ;;  %s1045_s28 = sphi %s1115_s28, %s1540_s28   ;;  %s1041_s27 = sphi %s1113_s27, %s1539_s27  }
   0x6   : > { %s849_s10 = sadd.s32 4294967294, %s1053_s30   ;;  %s1138_s11 = sadd.s32 1, %s1053_s30  }
   0x7   : > { %s31_s12 = sadd.s32 1, %s1049_s29  ;;  %s28_s13 = ssub.s32 %s1053_s30, %s1138_s11 }
   0x8   : > { %p38_p0 = scmp.ne.s32.totalorder %s1049_s29, %s1045_s28  ;;  %p29_p1 = scmp.eq.s32.totalorder %s28_s13, 0 }
   0x9   : > { %p39_p2 = scmp.eq.s32.totalorder %s1053_s30, 0  ;;  %p44_p3 = scmp.ne.s32.totalorder %s1045_s28, %s1041_s27 }
   0xa   : > { %p45_p4 = scmp.eq.s32.totalorder %s1134_s9, 0  ;;  %p215_p7 = scmp.eq.s32.totalorder %s1134_s9, 1 }
   0xb   : > { %s1150_s14 = scalar_select %p29_p1, %s1049_s29, %s31_s12  }
   0xc   : > { %p1152_p5 = por %p39_p2, %p38_p0  ;;  %p1156_p6 = por %p45_p4, %p44_p3 }
   0xd   : > { %1530 = sst [smem:[#allocation9_spill]] %s1150_s14  ;;  %p221_p8 = scmp.eq.s32.totalorder %s849_s10, 1 }
   0xe   : > { %p889_p10 = scmp.lt.s32.totalorder %s1053_s30, 2  ;;  %p1163_p11 = por %p215_p7, %p38_p0 }
   0xf   : > { %p1167_p12 = por %p221_p8, %p44_p3  ;;  %s262_s19 = sand.u32 1, %s1049_s29  }
  0x10   : > { %s874_s20 = sshll.u32 %s1053_s30, 3  ;;  %s852_s21 = sshll.u32 %s262_s19, 3 }
  0x11   : > { %s271_s24 = scalar_lea.hbm %s1519_s0, %s874_s20  ;;  %s266_s26 = scalar_lea.vmem [#allocation2], %s852_s21 }
  0x12   : > { %s273_s25 = sshll.u32 %s271_s24, 4  ;;  %s275_s10 = sshll.u32 %s266_s26, 4  ;;  %s274_s25 = int_to_ptr.hbm [resolvable:$true] %s273_s25  ;;  %s276_s10 = int_to_ptr.vmem [resolvable:$true] %s275_s10 }
  0x13   : > { %p1178_p13 = pnand %p889_p10, %p1152_p5  ;;  %p855_p0 = scmp.ge.s32.totalorder %s1053_s30, 1 }
  0x14   : > { %p280_p1 = scmp.lt.s32.totalorder %s1053_s30, 3  ;;  %s263_s13 = scalar_lea.sflag [#allocation3], %s262_s19 }
  0x15   : > { %s957_s14 = sshra.s32 %s274_s25, 4  ;;  %p961_p3 = pneg %p1178_p13  ;;  %s958_s14 = int_to_ptr.hbm [resolvable:$true] %s957_s14 }
  0x16   : > { %s959_s29 = scalar_lea.hbm %s958_s14, 8  ;;  %s964_s15 = scalar_lea.hbm %s1519_s0, 16 }
  0x17   : > { %p960_p2 = scmp.ne.s32.totalorder %s958_s14, %s959_s29  ;;  %p965_p5 = scmp.lt.s32.totalorder %s958_s14, %s1519_s0 }
  0x18   : > { %p966_p8 = scmp.lt.s32.totalorder %s964_s15, %s959_s29 }
  0x19   : > { %p962_p4 = pnand %p961_p3, %p960_p2 }
  0x1a   : > { %p967_p10 = por %p966_p8, %p965_p5 }
  0x1b   : > { %p963_p7 = pneg %p962_p4 }
  0x1d   : > { %p968_p9 = pnand %p967_p10, %p963_p7 }
  0x1f   : > { %971 = shalt.err (!%p968_p9)
}
  0x20   : > { %884 = dma.hbm_to_vmem [thread:$0]  (!%p1178_p13), %s274_s25, 128, %s276_s10, %s263_s13  }
  0x21   : > { %p281_p2 = pnand %p855_p0, %p280_p1 }
  0x22   : > { %s1199_s19 = sand.u32 (!%p281_p2), 1, %s1045_s28  }
  0x23   : > { %284 = sbr.rel (%p281_p2) target bundleno = 639 (0x27f), region = 52  ;;  %s856_s29 = sshll.u32 (!%p281_p2), %s1199_s19, 3 }
  0x24   : > { %s287_s14 = scalar_lea.sflag (!%p281_p2), [#allocation3], %s1199_s19  ;;  %s290_s24 = scalar_lea.vmem (!%p281_p2), [#allocation2], %s856_s29 }
  0x28   : > { %1032 = dma.done.wait (%p1156_p6), %s287_s14, 128  }
  0x29   : > { %1034 = vsyncadd (%p1156_p6), %s287_s14, 4294967168  ;;  %v1055_v0 = vmov 0   ;;  %v1056_v1 = vmov 1   ;;  %v338_v2 = vld [vmem:[%s1521_s2] sm:$0xff]  ;;  %v1217_v3 = vld [vmem:[%s1522_s3 + $0x8] sm:$0xff]  ;;  %vm359_vm0 = vcmask 1041408   ;;  %v413_v51 = vlaneseq }
  0x2a   : > { %936 = vset.pattern.permute.xlu0 %v1055_v0  ;;  %937 = vset.pattern.permute.xlu1 %v1055_v0  ;;  %v329_v4 = vld [vmem:[%s290_s24] sm:$0xff]  ;;  %v1223_v5 = vld [vmem:[%s1522_s3] sm:$0xff]  ;;  %v1057_v11 = vmov 3   ;;  %v1058_v12 = vmov 2   ;;  %vm355_vm1 = vcmask 31744   ;;  %v1059_v16 = vmov 4  }
  0x2b   : > { %938 = vset.pattern.permute.xlu2 %v1056_v1  ;;  %342 = vperm.xlu0 %936, %v338_v2   ;;  %331 = vst [vmem:[#allocation1] ss:$2 sm:$0xff] %v329_v4  ;;  %v339_v6 = vld [vmem:[%s1521_s2 + $0x8] sm:$0xff]  ;;  %v875_v15 = vld [vmem:[%s1520_s1] sm:$0xff]  ;;  %v1060_v17 = vmov 6   ;;  %v1061_v18 = vmov 7  }
  0x2c   : > { %473 = vperm.xlu1 %937, %v1217_v3   ;;  %493 = vperm.xlu2 %938, %v1223_v5   ;;  %s1062_s23 = smov 1   ;;  %s1063_s14 = smov 127   ;;  %v1280_v53 = vand.u32 127, %v413_v51  ;;  %v398_v54 = vld [vmem:[%s1526_s7] ss:$4 sm:$0x3] }
  0x2d   : > { %s1064_s24 = smov 112   ;;  %s1065_s25 = smov 16   ;;  %v421_v56 = vperm.slane %v398_v54, 0  ;;  %v422_v57 = vperm.slane %v398_v54, 1  ;;  %vm716_vm6 = vcmask 130048   ;;  %vm758_vm7 = vcmask 1043456  }
  0x2e   : > { %vm415_vm2 = vcmp.lt.s32.totalorder %v1280_v53, 1  ;;  %v1293_v63 = vld [vmem:[%s1526_s7 + $0x1] ss:$4 sm:$0x3]  ;;  %vm437_vm3 = vcmp.lt.s32.totalorder %v1280_v53, 127  ;;  %vm459_vm4 = vcmp.lt.s32.totalorder %v1280_v53, 16 }
  0x2f   : > { %vm597_vm5 = vcmp.lt.s32.totalorder %v1280_v53, 112  ;;  %s876_s16 = sshll.u32 %s1134_s9, 3  ;;  %s323_s15 = scalar_lea.vmem [#allocation5], %s856_s29 }
  0x30   : > { %s774_s21 = scalar_lea.hbm %s1527_s8, %s876_s16  ;;  %s776_s22 = sshll.u32 %s323_s15, 4  ;;  %s777_s22 = int_to_ptr.vmem [resolvable:$true] %s776_s22 }
  0x31   : > { %s763_s9 = scalar_lea.sflag [#allocation4], %s1199_s19  ;;  %s1007_s26 = scalar_lea.hbm %s1527_s8, 16 }
  0x32   : > { %v332_v7 = vld.sshfl [vmem:[#allocation1] sm:$0xff pattern:$0x75316420]  ;;  %v333_v8 = vld.sshfl [vmem:[#allocation1 + $0x8] sm:$0xff pattern:$0x75316420] }
  0x33   : > { %v336_v9 = vpack.c.bf16 %v332_v7, %v332_v7  ;;  %v337_v10 = vpack.c.bf16 %v333_v8, %v333_v8  ;;  %746 = vst [vmem:[#allocation1] ss:$2 sm:$0xff] %v329_v4  ;;  %347 = vperm.xlu0 %936, %v339_v6   ;;  %v443_v6 = vperm.slane %v1293_v63, 0 }
  0x34   : > { %942 = vset.pattern.permute.xlu1 %v1057_v11  ;;  %940 = vset.pattern.permute.xlu2 %v1058_v12 }
  0x35   : > { %546 = vperm.xlu1 %942, %v1223_v5   ;;  %v361_v13 = vsel %vm359_vm0, %v336_v9, 0  ;;  %v364_v14 = vsel %vm359_vm0, %v337_v10, 0  ;;  %521 = vperm.xlu2 %940, %v1223_v5  }
  0x36   : > { %373 = vmatpush.bf16.msra.mxu0 %v361_v13  ;;  %387 = vmatpush.bf16.msra.mxu1 %v364_v14 }
  0x39   : > { %862 = vmatmul.msk.bf16.vlgmr.msra.gmra.mxu0 %vm355_vm1, %v875_v15  ;;  %863 = vmatmul.msk.bf16.vlgmr.msra.gmra.mxu1 %vm355_vm1, %v875_v15  ;;  %v1066_v15 = vmov 5  }
  0x3b   : > { %468 = vperm.xlu0 %936, %v1223_v5  }
  0x3d   : > { %944 = vset.pattern.permute.xlu1 %v1059_v16  ;;  %943 = vset.pattern.permute.xlu2 %v1057_v11 }
  0x3e   : > { %558 = vperm.xlu1 %944, %v1223_v5   ;;  %550 = vperm.xlu2 %943, %v1217_v3  }
  0x43   : > { %939 = vset.pattern.permute.xlu0 %v1056_v1 }
  0x44   : > { %497 = vperm.xlu0 %939, %v1217_v3  }
  0x46   : > { %945 = vset.pattern.permute.xlu2 %v1059_v16  ;;  %947 = vset.pattern.permute.xlu1 %v1060_v17  ;;  %v444_v16 = vperm.slane %v1293_v63, 1 }
  0x47   : > { %562 = vperm.xlu2 %945, %v1217_v3   ;;  %607 = vperm.xlu1 %947, %v1217_v3  }
  0x4c   : > { %941 = vset.pattern.permute.xlu0 %v1058_v12 }
  0x4d   : > { %525 = vperm.xlu0 %941, %v1217_v3  }
  0x4f   : > { %948 = vset.pattern.permute.xlu2 %v1061_v18  ;;  %949 = vset.pattern.permute.xlu1 %v1061_v18 }
  0x50   : > { %627 = vperm.xlu2 %948, %v1223_v5   ;;  %631 = vperm.xlu1 %949, %v1217_v3  }
  0x55   : > { %946 = vset.pattern.permute.xlu0 %v1060_v17 }
  0x56   : > { %603 = vperm.xlu0 %946, %v1223_v5  }
  0x58   : > { %951 = vset.pattern.permute.xlu1 %v1066_v15 }
  0x5e   : > { %950 = vset.pattern.permute.xlu0 %v1066_v15 }
  0x86   : > { %v1244_v19 = vpop.permute.xlu2 %493 }
  0x8f   : > { %v1248_v21 = vpop.permute.xlu2 %521 }
  0x98   : > { %v1252_v24 = vpop.permute.xlu2 %550 }
  0x9d   : > { %v343_v23 = vpop.permute.xlu0 %342 }
  0x9e   : > { %v1246_v20 = vpop.permute.xlu1 %473 }
  0xa1   : > { %v563_v39 = vpop.permute.xlu2 %562 }
  0xa5   : > { %v348_v34 = vpop.permute.xlu0 %347 }
  0xa7   : > { %v1250_v22 = vpop.permute.xlu1 %546 }
  0xaa   : > { %v628_v46 = vpop.permute.xlu2 %627 }
  0xad   : > { %v1268_v44 = vpop.permute.xlu0 %468 }
  0xb0   : > { %v559_v29 = vpop.permute.xlu1 %558 }
  0xb6   : > { %v375_v25 = vpop.f32.mrf.mxu0  ;;  %v389_v26 = vpop.f32.mrf.mxu1 }
  0xb7   : > { %v376_v27 = vadd.f32 %v375_v25, %v343_v23  ;;  %v390_v28 = vadd.f32 %v389_v26, %v343_v23  ;;  %v1270_v45 = vpop.permute.xlu0 %497 }
  0xb9   : > { %v394_v30 = vmax.f32 %v376_v27, 0.0  ;;  %v395_v31 = vmax.f32 %v390_v28, 0.0  ;;  %v1272_v47 = vpop.permute.xlu1 %607 }
  0xbb   : > { %v1254_v32 = vmul.f32 %v559_v29, %v394_v30  ;;  %v566_v33 = vmul.f32 %v559_v29, %v395_v31  ;;  %409 = vrot.lane.b32.xlu2 %v395_v31, %s1062_s23  ;;  %429 = vrot.lane.b32.xlu0 %v394_v30, %s1063_s14 }
  0xbc   : > { %405 = vrot.lane.b32.xlu1 %v394_v30, %s1062_s23 }
  0xbe   : > { %v377_v35 = vpop.f32.mrf.mxu0  ;;  %v391_v36 = vpop.f32.mrf.mxu1 }
  0xbf   : > { %v378_v37 = vadd.f32 %v377_v35, %v348_v34  ;;  %v392_v38 = vadd.f32 %v391_v36, %v348_v34  ;;  %v1274_v48 = vpop.permute.xlu0 %525 }
  0xc1   : > { %v396_v40 = vmax.f32 %v378_v37, 0.0  ;;  %v397_v41 = vmax.f32 %v392_v38, 0.0 }
  0xc2   : > { %v1276_v50 = vpop.permute.xlu1 %631 }
  0xc3   : > { %v1256_v42 = vmul.f32 %v563_v39, %v396_v40  ;;  %v1258_v43 = vmul.f32 %v563_v39, %v397_v41  ;;  %433 = vrot.lane.b32.xlu2 %v395_v31, %s1063_s14  ;;  %618 = vrot.lane.b32.xlu0 %v395_v31, %s1064_s24 }
  0xc4   : > { %484 = vrot.lane.b32.xlu1 %v395_v31, %s1065_s25 }
  0xc8   : > { %v1278_v52 = vpop.permute.xlu0 %603 }
  0xcb   : > { %480 = vrot.lane.b32.xlu2 %v394_v30, %s1065_s25  ;;  %435 = vrot.lane.b32.xlu0 %v397_v41, %s1063_s14 }
  0xcc   : > { %614 = vrot.lane.b32.xlu1 %v394_v30, %s1064_s24  ;;  %v1067_v30 = vmov 8  }
  0xcd   : > { %952 = vset.pattern.permute.xlu2 %v1067_v30 }
  0xd3   : > { %411 = vrot.lane.b32.xlu2 %v397_v41, %s1062_s23  ;;  %482 = vrot.lane.b32.xlu0 %v396_v40, %s1065_s25 }
  0xd4   : > { %407 = vrot.lane.b32.xlu1 %v396_v40, %s1062_s23  ;;  %s778_s23 = sshll.u32 %s774_s21, 4  ;;  %s779_s23 = int_to_ptr.hbm [resolvable:$true] %s778_s23 }
  0xdb   : > { %486 = vrot.lane.b32.xlu2 %v397_v41, %s1065_s25 }
  0xdc   : > { %431 = vrot.lane.b32.xlu1 %v396_v40, %s1063_s14  ;;  %s1001_s14 = sshra.s32 %s779_s23, 4  ;;  %s1002_s14 = int_to_ptr.hbm [resolvable:$true] %s1001_s14 }
  0xdd   : > { %p1008_p0 = scmp.lt.s32.totalorder %s1002_s14, %s1527_s8 }
  0xe3   : > { %616 = vrot.lane.b32.xlu2 %v396_v40, %s1064_s24 }
  0xe4   : > { %620 = vrot.lane.b32.xlu1 %v397_v41, %s1064_s24 }
 0x115   : > { %v410_v49 = vpop.permute.xlu2 %409 }
 0x11d   : > { %v434_v55 = vpop.permute.xlu2 %433 }
 0x125   : > { %v481_v10 = vpop.permute.xlu2 %480 }
 0x12d   : > { %v430_v1 = vpop.permute.xlu0 %429  ;;  %v412_v29 = vpop.permute.xlu2 %411 }
 0x12e   : > { %v406_v58 = vpop.permute.xlu1 %405  ;;  %v438_v9 = vsel %vm437_vm3, %v430_v1, %v434_v55  ;;  %v440_v17 = vsel %vm437_vm3, %v434_v55, %v430_v1 }
 0x12f   : > { %v416_v59 = vsel %vm415_vm2, %v406_v58, %v410_v49  ;;  %v418_v60 = vsel %vm415_vm2, %v410_v49, %v406_v58  ;;  %v1318_v14 = vmul.f32 %v443_v6, %v438_v9  ;;  %v1333_v26 = vmul.f32 %v444_v16, %v440_v17 }
 0x130   : > { %v425_v61 = vmul.f32 %v421_v56, %v418_v60  ;;  %v426_v62 = vmul.f32 %v422_v57, %v416_v59  ;;  %v688_v59 = vld [vmem:[%s1523_s4 + $0x8] sm:$0xff] }
 0x132   : > { %v553_v2 = vmul.f32 %v1250_v22, %v425_v61  ;;  %v554_v4 = vmul.f32 %v1250_v22, %v426_v62  ;;  %451 = vrot.lane.b32.xlu1 %v425_v61, %s1065_s25  ;;  %593 = vrot.lane.b32.xlu2 %v426_v62, %s1064_s24 }
 0x133   : > { %455 = vrot.lane.b32.xlu0 %v426_v62, %s1065_s25 }
 0x134   : > { %v1303_v7 = vadd.f32 %v566_v33, %v554_v4  ;;  %v1306_v8 = vadd.f32 %v1254_v32, %v553_v2 }
 0x135   : > { %v619_v18 = vpop.permute.xlu0 %618  ;;  %v1351_v38 = vpop.permute.xlu2 %486 }
 0x136   : > { %v485_v11 = vpop.permute.xlu1 %484 }
 0x137   : > { %v1312_v12 = vsel %vm459_vm4, %v481_v10, %v485_v11  ;;  %v1316_v13 = vsel %vm459_vm4, %v485_v11, %v481_v10 }
 0x138   : > { %v500_v4 = vmul.f32 %v1244_v19, %v1316_v13 }
 0x13a   : > { %508 = vrot.lane.b32.xlu1 %v1318_v14, %s1065_s25  ;;  %642 = vrot.lane.b32.xlu2 %v1318_v14, %s1064_s24 }
 0x13b   : > { %589 = vrot.lane.b32.xlu0 %v425_v61, %s1064_s24 }
 0x13d   : > { %v436_v41 = vpop.permute.xlu0 %435 }
 0x13e   : > { %v615_v22 = vpop.permute.xlu1 %614 }
 0x13f   : > { %v622_v23 = vsel %vm597_vm5, %v615_v22, %v619_v18  ;;  %v624_v25 = vsel %vm597_vm5, %v619_v18, %v615_v22 }
 0x140   : > { %v1335_v27 = vmul.f32 %v628_v46, %v622_v23  ;;  %v1337_v28 = vmul.f32 %v628_v46, %v624_v25 }
 0x142   : > { %512 = vrot.lane.b32.xlu1 %v1333_v26, %s1065_s25 }
 0x145   : > { %v483_v62 = vpop.permute.xlu0 %482 }
 0x146   : > { %v408_v31 = vpop.permute.xlu1 %407 }
 0x147   : > { %v417_v32 = vsel %vm415_vm2, %v408_v31, %v412_v29  ;;  %v419_v33 = vsel %vm415_vm2, %v412_v29, %v408_v31 }
 0x148   : > { %v427_v34 = vmul.f32 %v421_v56, %v419_v33  ;;  %v428_v35 = vmul.f32 %v422_v57, %v417_v32 }
 0x14a   : > { %v555_v36 = vmul.f32 %v1252_v24, %v427_v34  ;;  %v556_v37 = vmul.f32 %v1252_v24, %v428_v35  ;;  %646 = vrot.lane.b32.xlu1 %v1333_v26, %s1064_s24  ;;  %453 = vrot.lane.b32.xlu2 %v427_v34, %s1065_s25 }
 0x14b   : > { %595 = vrot.lane.b32.xlu0 %v428_v35, %s1064_s24 }
 0x14c   : > { %v1354_v39 = vadd.f32 %v1256_v42, %v555_v36  ;;  %v1357_v40 = vadd.f32 %v1258_v43, %v556_v37  ;;  %v617_v43 = vpop.permute.xlu2 %616 }
 0x14e   : > { %v432_v46 = vpop.permute.xlu1 %431 }
 0x14f   : > { %v439_v24 = vsel %vm437_vm3, %v432_v46, %v436_v41  ;;  %v441_v42 = vsel %vm437_vm3, %v436_v41, %v432_v46 }
 0x150   : > { %v1361_v49 = vmul.f32 %v443_v6, %v439_v24  ;;  %v1374_v56 = vmul.f32 %v444_v16, %v441_v42  ;;  %v501_v6 = vmul.f32 %v1244_v19, %v1312_v12 }
 0x152   : > { %457 = vrot.lane.b32.xlu1 %v428_v35, %s1065_s25  ;;  %510 = vrot.lane.b32.xlu2 %v1361_v49, %s1065_s25 }
 0x153   : > { %644 = vrot.lane.b32.xlu0 %v1361_v49, %s1064_s24 }
 0x156   : > { %v621_v51 = vpop.permute.xlu1 %620 }
 0x157   : > { %v623_v54 = vsel %vm597_vm5, %v617_v43, %v621_v51  ;;  %v625_v55 = vsel %vm597_vm5, %v621_v51, %v617_v43 }
 0x158   : > { %v1377_v57 = vmul.f32 %v1276_v50, %v623_v54  ;;  %v1380_v58 = vmul.f32 %v1276_v50, %v625_v55  ;;  %v687_v50 = vld [vmem:[%s1523_s4] sm:$0xff] }
 0x159   : > { %v865_v55 = vld [vmem:[%s1526_s7 + $0x2] ss:$4 sm:$0x3] }
 0x15a   : > { %591 = vrot.lane.b32.xlu1 %v427_v34, %s1064_s24  ;;  %514 = vrot.lane.b32.xlu2 %v1374_v56, %s1065_s25 }
 0x15b   : > { %574 = vperm.xlu0 %950, %v1223_v5  }
 0x162   : > { %578 = vperm.xlu1 %951, %v1217_v3   ;;  %648 = vrot.lane.b32.xlu2 %v1374_v56, %s1064_s24  ;;  %s1003_s24 = scalar_lea.hbm %s1002_s14, 8 }
 0x163   : > { %955 = vset.pattern.permute.xlu0 %v1055_v0  ;;  %p1004_p6 = scmp.ne.s32.totalorder %s1002_s14, %s1003_s24  ;;  %p1009_p1 = scmp.lt.s32.totalorder %s1007_s26, %s1003_s24 }
 0x164   : > { %696 = vperm.xlu0 %955, %v688_v59   ;;  %v489_v59 = vsel %vm459_vm4, %v483_v62, %v1351_v38 }
 0x165   : > { %p1005_p9 = pnand %p1004_p6, %p1163_p11  ;;  %p1010_p3 = por %p1009_p1, %p1008_p0 }
 0x167   : > { %p1006_p13 = pneg %p1005_p9 }
 0x169   : > { %p1011_p4 = pnand %p1010_p3, %p1006_p13 }
 0x16a   : > { %953 = vset.pattern.permute.xlu1 %v1067_v30  ;;  %655 = vperm.xlu2 %952, %v1223_v5  }
 0x16b   : > { %659 = vperm.xlu1 %953, %v1217_v3  }
 0x172   : > { %954 = vset.pattern.permute.xlu2 %v1055_v0 }
 0x173   : > { %691 = vperm.xlu2 %954, %v687_v50   ;;  %956 = vset.pattern.permute.xlu1 %v1055_v0  ;;  %v491_v50 = vsel %vm459_vm4, %v1351_v38, %v483_v62 }
 0x18c   : > { %v594_v60 = vpop.permute.xlu2 %593 }
 0x194   : > { %v643_v61 = vpop.permute.xlu2 %642 }
 0x1a4   : > { %v454_v63 = vpop.permute.xlu2 %453  ;;  %v452_v1 = vpop.permute.xlu1 %451 }
 0x1a5   : > { %v456_v2 = vpop.permute.xlu0 %455 }
 0x1a6   : > { %v460_v5 = vsel %vm459_vm4, %v452_v1, %v456_v2  ;;  %v462_v3 = vsel %vm459_vm4, %v456_v2, %v452_v1  ;;  %v537_v1 = vperm.slane %v865_v55, 0  ;;  %v538_v2 = vperm.slane %v865_v55, 1 }
 0x1a7   : > { %v476_v0 = vmul.f32 %v1268_v44, %v462_v3  ;;  %v477_v9 = vmul.f32 %v1268_v44, %v460_v5  ;;  %v502_v5 = vmul.f32 %v1270_v45, %v491_v50  ;;  %v503_v3 = vmul.f32 %v1270_v45, %v489_v59 }
 0x1a9   : > { %v504_v10 = vadd.f32 %v500_v4, %v476_v0  ;;  %v505_v11 = vadd.f32 %v501_v6, %v477_v9 }
 0x1ac   : > { %v511_v15 = vpop.permute.xlu2 %510  ;;  %v509_v16 = vpop.permute.xlu1 %508 }
 0x1ad   : > { %v590_v17 = vpop.permute.xlu0 %589 }
 0x1ae   : > { %v598_v18 = vsel %vm597_vm5, %v590_v17, %v594_v60  ;;  %v600_v22 = vsel %vm597_vm5, %v594_v60, %v590_v17  ;;  %v866_v60 = vld [vmem:[%s1526_s7 + $0x3] ss:$4 sm:$0x3] }
 0x1af   : > { %v610_v13 = vmul.f32 %v1278_v52, %v598_v18  ;;  %v611_v23 = vmul.f32 %v1278_v52, %v600_v22  ;;  %v671_v6 = vperm.slane %v866_v60, 0  ;;  %v672_v0 = vperm.slane %v866_v60, 1 }
 0x1b1   : > { %v638_v19 = vadd.f32 %v1335_v27, %v610_v13  ;;  %v639_v12 = vadd.f32 %v1337_v28, %v611_v23 }
 0x1b4   : > { %v515_v44 = vpop.permute.xlu2 %514  ;;  %v513_v25 = vpop.permute.xlu1 %512 }
 0x1b5   : > { %v516_v29 = vsel %vm459_vm4, %v509_v16, %v513_v25  ;;  %v518_v30 = vsel %vm459_vm4, %v513_v25, %v509_v16  ;;  %v517_v38 = vsel %vm459_vm4, %v511_v15, %v515_v44  ;;  %v519_v62 = vsel %vm459_vm4, %v515_v44, %v511_v15  ;;  %v710_v15 = vld [vmem:[%s1525_s6] sm:$0xf] }
 0x1b6   : > { %v528_v31 = vmul.f32 %v1248_v21, %v518_v30  ;;  %v529_v32 = vmul.f32 %v1248_v21, %v516_v29  ;;  %713 = vperm.xlu1 %956, %v710_v15   ;;  %v530_v44 = vmul.f32 %v1274_v48, %v519_v62  ;;  %v747_v62 = vld.sshfl [vmem:[#allocation1] sm:$0xff pattern:$0x75316420] }
 0x1b8   : > { %v532_v33 = vadd.f32 %v528_v31, %v504_v10  ;;  %v533_v34 = vadd.f32 %v529_v32, %v505_v11 }
 0x1ba   : > { %v541_v13 = vmul.f32 %v537_v1, %v532_v33  ;;  %v542_v23 = vmul.f32 %v538_v2, %v533_v34 }
 0x1bc   : > { %v1424_v35 = vpop.permute.xlu2 %648  ;;  %v647_v52 = vpop.permute.xlu1 %646 }
 0x1bd   : > { %v596_v27 = vpop.permute.xlu0 %595  ;;  %v650_v28 = vsel %vm597_vm5, %v643_v61, %v647_v52  ;;  %v652_v36 = vsel %vm597_vm5, %v647_v52, %v643_v61 }
 0x1c4   : > { %v656_v37 = vpop.permute.xlu2 %655  ;;  %v458_v41 = vpop.permute.xlu1 %457 }
 0x1c5   : > { %v645_v46 = vpop.permute.xlu0 %644  ;;  %v662_v24 = vmul.f32 %v656_v37, %v650_v28  ;;  %v663_v42 = vmul.f32 %v656_v37, %v652_v36  ;;  %v461_v21 = vsel %vm459_vm4, %v454_v63, %v458_v41  ;;  %v463_v54 = vsel %vm459_vm4, %v458_v41, %v454_v63 }
 0x1c6   : > { %v478_v61 = vmul.f32 %v1246_v20, %v463_v54  ;;  %v479_v63 = vmul.f32 %v1246_v20, %v461_v21  ;;  %v651_v41 = vsel %vm597_vm5, %v645_v46, %v1424_v35 }
 0x1c7   : > { %v666_v43 = vadd.f32 %v662_v24, %v638_v19  ;;  %v667_v51 = vadd.f32 %v663_v42, %v639_v12  ;;  %v653_v24 = vsel %vm597_vm5, %v1424_v35, %v645_v46 }
 0x1c8   : > { %v506_v18 = vadd.f32 %v502_v5, %v478_v61  ;;  %v507_v22 = vadd.f32 %v503_v3, %v479_v63  ;;  %v707_v3 = vld [vmem:[%s1524_s5] sm:$0x3] }
 0x1c9   : > { %v675_v25 = vmul.f32 %v671_v6, %v666_v43  ;;  %v676_v29 = vmul.f32 %v672_v0, %v667_v51 }
 0x1ca   : > { %v534_v32 = vadd.f32 %v530_v44, %v506_v18 }
 0x1cc   : > { %v592_v4 = vpop.permute.xlu1 %591  ;;  %v543_v28 = vmul.f32 %v537_v1, %v534_v32 }
 0x1cd   : > { %v575_v9 = vpop.permute.xlu0 %574  ;;  %v599_v10 = vsel %vm597_vm5, %v592_v4, %v596_v27  ;;  %v601_v20 = vsel %vm597_vm5, %v596_v27, %v592_v4 }
 0x1ce   : > { %v581_v11 = vmul.f32 %v575_v9, %v1318_v14  ;;  %v582_v45 = vmul.f32 %v575_v9, %v1333_v26  ;;  %v612_v16 = vmul.f32 %v1272_v47, %v599_v10  ;;  %v613_v17 = vmul.f32 %v1272_v47, %v601_v20 }
 0x1cf   : > { %v531_v47 = vmul.f32 %v1274_v48, %v517_v38 }
 0x1d0   : > { %v585_v19 = vadd.f32 %v581_v11, %v1306_v8  ;;  %v586_v12 = vadd.f32 %v582_v45, %v1303_v7  ;;  %v640_v14 = vadd.f32 %v1377_v57, %v612_v16  ;;  %v641_v26 = vadd.f32 %v1380_v58, %v613_v17 }
 0x1d1   : > { %v535_v33 = vadd.f32 %v531_v47, %v507_v22 }
 0x1d2   : > { %v679_v30 = vadd.f32 %v585_v19, %v541_v13  ;;  %v680_v31 = vadd.f32 %v586_v12, %v542_v23 }
 0x1d3   : > { %v544_v36 = vmul.f32 %v538_v2, %v535_v33 }
 0x1d4   : > { %v683_v34 = vadd.f32 %v679_v30, %v675_v25  ;;  %v684_v52 = vadd.f32 %v680_v31, %v676_v29  ;;  %v579_v8 = vpop.permute.xlu1 %578 }
 0x1d5   : > { %v583_v7 = vmul.f32 %v579_v8, %v1361_v49  ;;  %v584_v57 = vmul.f32 %v579_v8, %v1374_v56 }
 0x1d6   : > { %v697_v54 = vpop.permute.xlu0 %696 }
 0x1d7   : > { %v587_v58 = vadd.f32 %v583_v7, %v1354_v39  ;;  %v588_v27 = vadd.f32 %v584_v57, %v1357_v40  ;;  %v692_v39 = vpop.permute.xlu2 %691 }
 0x1d8   : > { %v699_v55 = vadd.f32 %v692_v39, %v683_v34  ;;  %v700_v59 = vadd.f32 %v692_v39, %v684_v52 }
 0x1d9   : > { %v681_v48 = vadd.f32 %v587_v58, %v543_v28  ;;  %v682_v37 = vadd.f32 %v588_v27, %v544_v36 }
 0x1da   : > { %v703_v1 = vmax.f32 %v699_v55, 0.0  ;;  %v704_v2 = vmax.f32 %v700_v59, 0.0 }
 0x1dd   : > { %v660_v42 = vpop.permute.xlu1 %659 }
 0x1de   : > { %v664_v49 = vmul.f32 %v660_v42, %v651_v41  ;;  %v665_v43 = vmul.f32 %v660_v42, %v653_v24 }
 0x1e0   : > { %v668_v56 = vadd.f32 %v664_v49, %v640_v14  ;;  %v669_v51 = vadd.f32 %v665_v43, %v641_v26 }
 0x1e2   : > { %v677_v21 = vmul.f32 %v671_v6, %v668_v56  ;;  %v678_v40 = vmul.f32 %v672_v0, %v669_v51  ;;  %v748_v0 = vld.sshfl [vmem:[#allocation1 + $0x8] sm:$0xff pattern:$0x75316420] }
 0x1e4   : > { %v685_v50 = vadd.f32 %v681_v48, %v677_v21  ;;  %v686_v60 = vadd.f32 %v682_v37, %v678_v40 }
 0x1e6   : > { %v701_v61 = vadd.f32 %v697_v54, %v685_v50  ;;  %v702_v63 = vadd.f32 %v697_v54, %v686_v60 }
 0x1e8   : > { %v705_v53 = vmax.f32 %v701_v61, 0.0  ;;  %v706_v35 = vmax.f32 %v702_v63, 0.0 }
 0x1ea   : > { %v708_v46 = vpack.c.bf16 %v705_v53, %v703_v1  ;;  %v709_v5 = vpack.c.bf16 %v706_v35, %v704_v2 }
 0x1ec   : > { %727 = vmatpush.bf16.msra.mxu2 %v708_v46  ;;  %740 = vmatpush.bf16.msra.mxu3 %v709_v5 }
 0x1ef   : > { %867 = vmatmul.msk.bf16.vlgmr.msra.gmra.mxu2 %vm716_vm6, %v707_v3  ;;  %868 = vmatmul.msk.bf16.vlgmr.msra.gmra.mxu3 %vm716_vm6, %v707_v3 }
 0x228   : > { %v714_v4 = vpop.permute.xlu1 %713 }
 0x272   : > { %v742_v6 = vpop.f32.mrf.mxu3  ;;  %v729_v38 = vpop.f32.mrf.mxu2 }
 0x273   : > { %v743_v9 = vadd.f32 %v742_v6, %v714_v4  ;;  %v730_v10 = vadd.f32 %v729_v38, %v714_v4 }
 0x275   : > { %v752_v20 = vadd.f32 %v748_v0, %v743_v9  ;;  %v751_v11 = vadd.f32 %v747_v62, %v730_v10 }
 0x277   : > { %v754_v45 = vmax.f32 %v752_v20, 0.0  ;;  %v753_v17 = vmax.f32 %v751_v11, 0.0 }
 0x279   : > { %v757_v16 = vrot.slane %v754_v45, 4 }
 0x27a   : > { %v731_v18 = vpop.f32.mrf.mxu2  ;;  %v744_v22 = vpop.f32.mrf.mxu3 }
 0x27b   : > { %v759_v13 = vsel %vm758_vm7, %v753_v17, %v757_v16 }
 0x27c   : > { %761 = vst [vmem:[%s323_s15] sm:$0xff] %v759_v13 }
 0x27d   : > { %1014 = shalt.err (!%p1011_p4)
}
 0x27e   : > { %879 = dma.vmem_to_hbm [thread:$0]  (%p1163_p11), %s777_s22, 128, %s779_s23, %s763_s9  }
 0x27f PF: > { %s790_s19 = sand.u32 1, %s1041_s27   ;;  %p1536_p7 = scmp.ge.s32.totalorder %s1053_s30, 2 }
 0x280   : > { %s791_s16 = scalar_lea.sflag [#allocation4], %s790_s19 }
 0x281   : > { %p886_p5 = pnand %p1536_p7, %p1167_p12 }
 0x283   : > { %p887_p8 = pneg %p886_p5 }
 0x285   : > { %1036 = dma.done.wait (%p887_p8), %s791_s16, 128  }
 0x286   : > { %1038 = vsyncadd (%p887_p8), %s791_s16, 4294967168  ;;  %s1537_s13 = sld [smem:[#allocation8_spill]]  ;;  %p21_p10 = scmp.ge.s32.totalorder %s1138_s11, 4  }
 0x287   : > { %s1538_s29 = sld [smem:[#allocation9_spill]]  ;;  %s1539_s27 = smov %s1045_s28 }
 0x288   : > { %s1541_s30 = smov %s1138_s11  ;;  %23 = sbr.rel (!%p21_p10) target bundleno = 5 (0x5), region = 100 }
 0x28c   : > { %s1540_s28 = smov %s1537_s13 }
 0x28d   :  { %797 = vsyncpa [#allocation3], 1 }
 0x28e   :  { %799 = vsyncpa [#allocation3 + $0x1], 1 }
 0x28f   :  { %800 = vsyncpa [#allocation4], 1 }
 0x290   :  { %802 = vsyncpa [#allocation4 + $0x1], 1 }

</bundles_post_ra>
